<compile_context>
chip_gen: v5e
topology: v5e:2x2
jax: 0.10.0
libtpu: 0.0.40
codegen_flags: <defaults>
</compile_context>

<pallas_src>
import functools

import jax
import jax.numpy as jnp
from jax.experimental import pallas as pl
from jax.experimental.pallas import tpu as pltpu


# --------------------------------------------------------------------------- #
# Phase 1: per-row (megacore-parallel) per-channel partial statistics
# --------------------------------------------------------------------------- #
def _stats_kernel(x_ref, mean_ref, m2_ref, *, n_tile):
    # Grid (Ni, Nj) with semantics ("parallel", "arbitrary").
    # x_ref: (bn, C, bl) f32 tile.  mean_ref / m2_ref: (1, C, 1) f32 output
    # blocks indexed only by i -> they stay VMEM-resident across the j axis and
    # act as per-row accumulators (Chan parallel-variance combine over L-tiles).
    j = pl.program_id(1)

    @pl.when(j == 0)
    def _init():
        mean_ref[...] = jnp.zeros_like(mean_ref)
        m2_ref[...] = jnp.zeros_like(m2_ref)

    x = x_ref[...]                                        # (bn, C, bl)

    # Per-tile per-channel partials; C stays on the sublane axis throughout
    # (no relayout).  Leading-dim reduce is plain VALU adds; the lane (XLU)
    # reduce happens once per tile and hides under the DMA (mem-bound pass).
    s = jnp.sum(x, axis=0, keepdims=True)                 # (1, C, bl)
    tile_sum = jnp.sum(s, axis=2, keepdims=True)          # (1, C, 1)
    tile_mean = tile_sum * (1.0 / n_tile)                 # (1, C, 1)
    d = x - tile_mean                                     # broadcast over N, L
    dsq = jnp.sum(d * d, axis=0, keepdims=True)           # (1, C, bl)
    tile_m2 = jnp.sum(dsq, axis=2, keepdims=True)         # (1, C, 1)

    # Chan combine with the running per-row (count, mean, M2); exact at j == 0
    # because count_a == 0 there.
    count_a = j.astype(jnp.float32) * n_tile
    count = count_a + n_tile
    delta = tile_mean - mean_ref[...]
    mean_ref[...] = mean_ref[...] + delta * (n_tile / count)
    m2_ref[...] = m2_ref[...] + tile_m2 + (delta * delta) * (count_a * n_tile / count)


# --------------------------------------------------------------------------- #
# Phase 2: one FMA + clamp per element
# --------------------------------------------------------------------------- #
def _normalize_kernel(x_ref, scale_ref, bias_ref, o_ref, *, clamp_hi):
    y = x_ref[...] * scale_ref[...] + bias_ref[...]       # (bn,C,bl)*(1,C,1)+(1,C,1)
    o_ref[...] = jnp.clip(y, -1.0, clamp_hi).astype(o_ref.dtype)


# --------------------------------------------------------------------------- #
# Tile / VMEM-budget selection helpers
# --------------------------------------------------------------------------- #
def _largest_divisor_leq(n, cap):
    cap = max(1, min(n, cap))
    for d in range(cap, 0, -1):
        if n % d == 0:
            return d
    return 1


def _vmem_limit_bytes():
    """Generation-aware scoped-VMEM budget (explicitly passed to Mosaic)."""
    try:
        cap = int(pltpu.get_tpu_info().vmem_capacity_bytes)
    except Exception:
        cap = 64 * 1024 * 1024  # unknown chip: assume smallest per-core VMEM (v7x)
    # ~5/8 of physical, capped at 64 MiB: 64 MiB on v5e/v6e (128 MiB chips),
    # 40 MiB on v7x (64 MiB per-TC), leaving headroom for compiler scratch.
    return min((cap * 5) // 8, 64 * 1024 * 1024)


def _auto_block_l(L):
    if L % 128 == 0:
        # largest multiple of 128 dividing L, capped at 4096 lanes
        return 128 * _largest_divisor_leq(L // 128, 32)
    # Non-aligned L: full-L lane block is always a legal BlockSpec.
    return L


def _auto_block_n(N, C, block_l, budget_bytes):
    c_pad = -(-C // 8) * 8
    l_pad = -(-block_l // 128) * 128
    cap = max(1, budget_bytes // (4 * c_pad * l_pad))
    return _largest_divisor_leq(N, cap)


# --------------------------------------------------------------------------- #
# Wrapper
# --------------------------------------------------------------------------- #
def adaptive_fixed_point_normalizer(x, gamma, beta, *, normalize_bits=8, eps=1e-5,
                                    block_n=None, block_l=None,
                                    out_dtype=None, donate_x=False):
    """x: (N, C, L) f32, gamma/beta: (C,) f32.  Returns (N, C, L)."""
    x = x.astype(jnp.float32)
    N, C, L = x.shape
    inv_factor = 1.0 / (2.0 ** (normalize_bits - 1))
    clamp_hi = 1.0 - inv_factor
    out_dtype = x.dtype if out_dtype is None else jnp.dtype(out_dtype)

    vmem_limit = _vmem_limit_bytes()

    # ---- tile selection: native NCL layout, L on lanes, C on sublanes -------
    if block_l is None:
        block_l = _auto_block_l(L)
    # Phase 1 double-buffers only x (2x block live); phase 2 double-buffers
    # x-in and y-out (4x block live) -> give phase 1 roughly 2x larger blocks.
    bn_stats = block_n if block_n is not None else _auto_block_n(N, C, block_l,
                                                                 vmem_limit // 3)
    bn_norm = block_n if block_n is not None else _auto_block_n(N, C, block_l,
                                                                vmem_limit // 5)
    assert L % block_l == 0, "lane tile must divide L"
    assert N % bn_stats == 0 and N % bn_norm == 0, "batch tiles must divide N"

    gamma = jnp.asarray(gamma, jnp.float32).reshape(C)
    beta = jnp.asarray(beta, jnp.float32).reshape(C)

    # ---- pass 1: per-row (parallel) per-channel (mean, M2) partials ---------
    ni, nj = N // bn_stats, L // block_l
    x_spec1 = pl.BlockSpec((bn_stats, C, block_l), lambda i, j: (i, 0, j))
    part_spec = pl.BlockSpec((1, C, 1), lambda i, j: (i, 0, 0))
    mean_part, m2_part = pl.pallas_call(
        functools.partial(_stats_kernel, n_tile=float(bn_stats * block_l)),
        out_shape=(jax.ShapeDtypeStruct((ni, C, 1), jnp.float32),
                   jax.ShapeDtypeStruct((ni, C, 1), jnp.float32)),
        grid=(ni, nj),
        in_specs=[x_spec1],
        out_specs=(part_spec, part_spec),
        compiler_params=pltpu.CompilerParams(
            dimension_semantics=("parallel", "arbitrary"),
            vmem_limit_bytes=vmem_limit),
        cost_estimate=pl.CostEstimate(flops=int(4 * N * C * L),
                                      transcendentals=0,
                                      bytes_accessed=int(4 * N * C * L + 8 * ni * C)),
    )(x)

    # ---- epilogue: exact fold of the (ni, C) row partials (tiny, pure JAX) --
    mean_rows = mean_part[:, :, 0]                         # (ni, C)
    m2_rows = m2_part[:, :, 0]                             # (ni, C)
    row_n = float(bn_stats * L)                            # equal per-row counts
    mean_all = jnp.mean(mean_rows, axis=0)                 # (C,)
    m2_all = jnp.sum(m2_rows, axis=0) + row_n * jnp.sum(
        (mean_rows - mean_all[None, :]) ** 2, axis=0)
    var = m2_all * (1.0 / float(N * L))                    # biased variance
    inv_std = jax.lax.rsqrt(var + eps)
    scale_c = gamma * inv_std * inv_factor                 # folded scale
    bias_c = beta * inv_factor - scale_c * mean_all        # folded bias
    scale = scale_c.reshape(1, C, 1)
    bias = bias_c.reshape(1, C, 1)

    # ---- pass 2: y = clip(x*scale + bias, -1, 1 - 1/2^(bits-1)) -------------
    ni2, nj2 = N // bn_norm, L // block_l
    x_spec2 = pl.BlockSpec((bn_norm, C, block_l), lambda i, j: (i, 0, j))
    vec_spec = pl.BlockSpec((1, C, 1), lambda i, j: (0, 0, 0))
    alias = {0: 0} if (donate_x and out_dtype == jnp.float32) else {}
    out = pl.pallas_call(
        functools.partial(_normalize_kernel, clamp_hi=clamp_hi),
        out_shape=jax.ShapeDtypeStruct((N, C, L), out_dtype),
        grid=(ni2, nj2),
        in_specs=[x_spec2, vec_spec, vec_spec],
        out_specs=x_spec2,
        input_output_aliases=alias,
        compiler_params=pltpu.CompilerParams(
            dimension_semantics=("parallel", "parallel"),
            vmem_limit_bytes=vmem_limit),
        cost_estimate=pl.CostEstimate(
            flops=int(4 * N * C * L),
            transcendentals=0,
            bytes_accessed=int(N * C * L * (4 + jnp.dtype(out_dtype).itemsize))),
    )(x, scale, bias)
    return out


# --------------------------------------------------------------------------- #
# Pure-JAX reference for correctness checking
# --------------------------------------------------------------------------- #
def _reference(x, gamma, beta, *, normalize_bits=8, eps=1e-5):
    mean = jnp.mean(x, axis=(0, 2), keepdims=True)
    var = jnp.mean((x - mean) ** 2, axis=(0, 2), keepdims=True)
    xhat = (x - mean) / jnp.sqrt(var + eps)
    y = xhat * gamma[None, :, None] + beta[None, :, None]
    nf = 2.0 ** (normalize_bits - 1)
    y = y / nf
    return jnp.clip(y, -1.0, 1.0 - 1.0 / nf)


if __name__ == "__main__":
    key = jax.random.PRNGKey(0)
    kx, kg, kb, kx2 = jax.random.split(key, 4)

    C = 40  # num_features=40 per the module's default __init__

    gamma = 1.0 + 0.1 * jax.random.normal(kg, (C,), dtype=jnp.float32)
    beta = 0.1 * jax.random.normal(kb, (C,), dtype=jnp.float32)

    # Case 1: 128-aligned L with explicit small tiles -> multi-tile (2x2) grid,
    # exercises the per-row Chan accumulation + the partial-fold epilogue.
    N1, L1 = 4, 256
    x1 = jax.random.normal(kx, (N1, C, L1), dtype=jnp.float32) * 3.0 + 1.5
    out1 = adaptive_fixed_point_normalizer(x1, gamma, beta, normalize_bits=8,
                                           block_n=2, block_l=128)
    out1 = jax.block_until_ready(out1)
    ref1 = _reference(x1, gamma, beta, normalize_bits=8)
    assert out1.shape == (N1, C, L1)
    assert float(jnp.max(jnp.abs(out1 - ref1))) < 1e-5, "mismatch vs reference (case 1)"

    # Case 2: non-aligned L -> full-L lane block, fully automatic tile selection
    # (per-phase VMEM-budget-derived blocks).
    N2, L2 = 2, 48
    x2 = jax.random.normal(kx2, (N2, C, L2), dtype=jnp.float32) * 2.0
    out2 = adaptive_fixed_point_normalizer(x2, gamma, beta, normalize_bits=8)
    out2 = jax.block_until_ready(out2)
    ref2 = _reference(x2, gamma, beta, normalize_bits=8)
    assert out2.shape == (N2, C, L2)
    assert float(jnp.max(jnp.abs(out2 - ref2))) < 1e-5, "mismatch vs reference (case 2)"

    print("KERNEL_OK")
</pallas_src>

<mosaic_0001>
module attributes {stable_mosaic.version = 11 : i64} {
  func.func @_stats_kernel(%arg0: i32, %arg1: i32, %arg2: memref<2x40x128xf32, #tpu.memory_space<vmem>>, %arg3: memref<1x40x1xf32, #tpu.memory_space<vmem>>, %arg4: memref<1x40x1xf32, #tpu.memory_space<vmem>>) attributes {dimension_semantics = [#tpu.dimension_semantics<parallel>, #tpu.dimension_semantics<arbitrary>], iteration_bounds = array<i64: 2, 2>, scalar_prefetch = 0 : i64, scratch_operands = 0 : i64, tpu.core_type = #tpu.core_type<tc>, window_params = [{transform_indices = @transform_0, window_bounds = array<i64: 2, 40, 128>}, {transform_indices = @transform_1, window_bounds = array<i64: 1, 40, 1>}, {transform_indices = @transform_2, window_bounds = array<i64: 1, 40, 1>}]} {
    %c0_i32 = arith.constant 0 : i32
    %0 = arith.cmpi eq, %arg1, %c0_i32 : i32
    %1 = arith.extui %0 : i1 to i32
    %c0_i32_0 = arith.constant 0 : i32
    %2 = arith.cmpi ne, %1, %c0_i32_0 : i32
    scf.if %2 {
      %cst_26 = arith.constant 0.000000e+00 : f32
      %37 = vector.broadcast %cst_26 : f32 to vector<1x40x1xf32>
      %c0_27 = arith.constant 0 : index
      %c0_28 = arith.constant 0 : index
      %c0_29 = arith.constant 0 : index
      %38 = vector.load %arg3[%c0_27, %c0_28, %c0_29] : memref<1x40x1xf32, #tpu.memory_space<vmem>>, vector<1x40x1xf32>
      tpu.vector_store %arg3[%c0_27, %c0_28, %c0_29], %37 {strides = array<i32>} : memref<1x40x1xf32, #tpu.memory_space<vmem>>, vector<1x40x1xf32>,
      %cst_30 = arith.constant 0.000000e+00 : f32
      %39 = vector.broadcast %cst_30 : f32 to vector<1x40x1xf32>
      %c0_31 = arith.constant 0 : index
      %c0_32 = arith.constant 0 : index
      %c0_33 = arith.constant 0 : index
      %40 = vector.load %arg4[%c0_31, %c0_32, %c0_33] : memref<1x40x1xf32, #tpu.memory_space<vmem>>, vector<1x40x1xf32>
      tpu.vector_store %arg4[%c0_31, %c0_32, %c0_33], %39 {strides = array<i32>} : memref<1x40x1xf32, #tpu.memory_space<vmem>>, vector<1x40x1xf32>,
    } else {
    }
    %c0 = arith.constant 0 : index
    %c0_1 = arith.constant 0 : index
    %c0_2 = arith.constant 0 : index
    %3 = vector.load %arg2[%c0, %c0_1, %c0_2] : memref<2x40x128xf32, #tpu.memory_space<vmem>>, vector<2x40x128xf32>
    %cst = arith.constant dense<0.000000e+00> : vector<40x128xf32>
    %4 = vector.multi_reduction <add>, %3, %cst [0] : vector<2x40x128xf32> to vector<40x128xf32>
    %5 = vector.shape_cast %4 : vector<40x128xf32> to vector<1x40x128xf32>
    %cst_3 = arith.constant dense<0.000000e+00> : vector<1x40xf32>
    %6 = vector.multi_reduction <add>, %5, %cst_3 [2] : vector<1x40x128xf32> to vector<1x40xf32>
    %7 = vector.shape_cast %6 : vector<1x40xf32> to vector<1x40x1xf32>
    %cst_4 = arith.constant 3.906250e-03 : f32
    %8 = vector.broadcast %cst_4 : f32 to vector<1x40x1xf32>
    %9 = arith.mulf %7, %8 : vector<1x40x1xf32>
    %10 = vector.broadcast %9 : vector<1x40x1xf32> to vector<2x40x128xf32>
    %11 = arith.subf %3, %10 : vector<2x40x128xf32>
    %12 = arith.mulf %11, %11 : vector<2x40x128xf32>
    %cst_5 = arith.constant dense<0.000000e+00> : vector<40x128xf32>
    %13 = vector.multi_reduction <add>, %12, %cst_5 [0] : vector<2x40x128xf32> to vector<40x128xf32>
    %14 = vector.shape_cast %13 : vector<40x128xf32> to vector<1x40x128xf32>
    %cst_6 = arith.constant dense<0.000000e+00> : vector<1x40xf32>
    %15 = vector.multi_reduction <add>, %14, %cst_6 [2] : vector<1x40x128xf32> to vector<1x40xf32>
    %16 = vector.shape_cast %15 : vector<1x40xf32> to vector<1x40x1xf32>
    %17 = arith.sitofp %arg1 : i32 to f32
    %cst_7 = arith.constant 2.560000e+02 : f32
    %18 = arith.mulf %17, %cst_7 : f32
    %cst_8 = arith.constant 2.560000e+02 : f32
    %19 = arith.addf %18, %cst_8 : f32
    %c0_9 = arith.constant 0 : index
    %c0_10 = arith.constant 0 : index
    %c0_11 = arith.constant 0 : index
    %20 = vector.load %arg3[%c0_9, %c0_10, %c0_11] : memref<1x40x1xf32, #tpu.memory_space<vmem>>, vector<1x40x1xf32>
    %21 = arith.subf %9, %20 : vector<1x40x1xf32>
    %c0_12 = arith.constant 0 : index
    %c0_13 = arith.constant 0 : index
    %c0_14 = arith.constant 0 : index
    %22 = vector.load %arg3[%c0_12, %c0_13, %c0_14] : memref<1x40x1xf32, #tpu.memory_space<vmem>>, vector<1x40x1xf32>
    %cst_15 = arith.constant 2.560000e+02 : f32
    %23 = arith.divf %cst_15, %19 : f32
    %24 = vector.broadcast %23 : f32 to vector<1x40x1xf32>
    %25 = arith.mulf %21, %24 : vector<1x40x1xf32>
    %26 = arith.addf %22, %25 : vector<1x40x1xf32>
    %c0_16 = arith.constant 0 : index
    %c0_17 = arith.constant 0 : index
    %c0_18 = arith.constant 0 : index
    %27 = vector.load %arg3[%c0_16, %c0_17, %c0_18] : memref<1x40x1xf32, #tpu.memory_space<vmem>>, vector<1x40x1xf32>
    tpu.vector_store %arg3[%c0_16, %c0_17, %c0_18], %26 {strides = array<i32>} : memref<1x40x1xf32, #tpu.memory_space<vmem>>, vector<1x40x1xf32>,
    %c0_19 = arith.constant 0 : index
    %c0_20 = arith.constant 0 : index
    %c0_21 = arith.constant 0 : index
    %28 = vector.load %arg4[%c0_19, %c0_20, %c0_21] : memref<1x40x1xf32, #tpu.memory_space<vmem>>, vector<1x40x1xf32>
    %29 = arith.addf %28, %16 : vector<1x40x1xf32>
    %30 = arith.mulf %21, %21 : vector<1x40x1xf32>
    %cst_22 = arith.constant 2.560000e+02 : f32
    %31 = arith.mulf %18, %cst_22 : f32
    %32 = arith.divf %31, %19 : f32
    %33 = vector.broadcast %32 : f32 to vector<1x40x1xf32>
    %34 = arith.mulf %30, %33 : vector<1x40x1xf32>
    %35 = arith.addf %29, %34 : vector<1x40x1xf32>
    %c0_23 = arith.constant 0 : index
    %c0_24 = arith.constant 0 : index
    %c0_25 = arith.constant 0 : index
    %36 = vector.load %arg4[%c0_23, %c0_24, %c0_25] : memref<1x40x1xf32, #tpu.memory_space<vmem>>, vector<1x40x1xf32>
    tpu.vector_store %arg4[%c0_23, %c0_24, %c0_25], %35 {strides = array<i32>} : memref<1x40x1xf32, #tpu.memory_space<vmem>>, vector<1x40x1xf32>,
    return
  }
  func.func @transform_0(%arg0: i32, %arg1: i32) -> (i32, i32, i32) {
    %c0_i32 = arith.constant 0 : i32
    %c0_i32_0 = arith.constant 0 : i32
    return %arg0, %c0_i32, %arg1 : i32, i32, i32
  }
  func.func @transform_1(%arg0: i32, %arg1: i32) -> (i32, i32, i32) {
    %c0_i32 = arith.constant 0 : i32
    %c0_i32_0 = arith.constant 0 : i32
    %c0_i32_1 = arith.constant 0 : i32
    return %arg0, %c0_i32, %c0_i32_0 : i32, i32, i32
  }
  func.func @transform_2(%arg0: i32, %arg1: i32) -> (i32, i32, i32) {
    %c0_i32 = arith.constant 0 : i32
    %c0_i32_0 = arith.constant 0 : i32
    %c0_i32_1 = arith.constant 0 : i32
    return %arg0, %c0_i32, %c0_i32_0 : i32, i32, i32
  }
}

</mosaic_0001>

<bundles_post_ra>
// kernel: tpu_custom_call.1
= control target key start
LH: loop header
LB: loop body
LE: loop exit
PB: predicated region body
PF: predicated region fallthrough
CT: control target
= control target key end

     0   :  { %8 = vsyncpa [#allocation3], 0  ;;  %s898_s0 = inlined_call_operand.hbm [shape: f32[4,40,256], index: 0, kind: input, shape index: {}]   ;;  %s899_s1 = inlined_call_operand.vmem [shape: f32[2,40,1], index: 1, kind: output, shape index: {0}]   ;;  %s900_s2 = inlined_call_operand.vmem [shape: f32[2,40,1], index: 2, kind: output, shape index: {1}]  }
   0x1   :  { %10 = vsyncpa [#allocation3 + $0x1], 0  ;;  %s698_s9 = smov 0   ;;  %s700_s10 = smov 0  }
   0x2   :  { %s702_s11 = smov 0   ;;  %s704_s12 = smov 0  }
   0x3   :  { %s706_s13 = smov 0   ;;  %s708_s14 = smov 0  }
   0x4   :  { %s710_s15 = smov 0   ;;  %s712_s16 = smov 0  }
   0x5 LB: > { %s485_s17 = sadd.s32 4294967295, %s677_s16   ;;  %s25_s18 = sadd.s32 1, %s669_s14  ;;  %s677_s16 = sphi %s712_s16, %s16_s16   ;;  %s673_s15 = sphi %s710_s15, %s909_s15   ;;  %s669_s14 = sphi %s708_s14, %s908_s14   ;;  %s665_s13 = sphi %s706_s13, %s907_s13   ;;  %s661_s12 = sphi %s704_s12, %s906_s12   ;;  %s657_s11 = sphi %s702_s11, %s905_s11   ;;  %s653_s10 = sphi %s700_s10, %s904_s10   ;;  %s649_s9 = sphi %s698_s9, %s903_s9  }
   0x6   : > { %p26_p0 = scmp.ge.s32.totalorder %s25_s18, 2  ;;  %s28_s19 = sadd.s32 1, %s673_s15 }
   0x7   : > { %s37_s20 = sadd.s32 1, %s657_s11  ;;  %p44_p1 = scmp.ne.s32.totalorder %s657_s11, %s653_s10 }
   0x8   : > { %s911_s18 = smov (%p26_p0, %s25_s18), 0  ;;  %s913_s19 = smov (!%p26_p0, %s28_s19), %s673_s15 }
   0x9   : > { %s33_s21 = ssub.s32 %s669_s14, %s911_s18  ;;  %p45_p2 = scmp.eq.s32.totalorder %s677_s16, 0 }
   0xa   : > { %p30_p3 = scmp.ge.s32.totalorder %s913_s19, 2  ;;  %p50_p4 = scmp.ne.s32.totalorder %s653_s10, %s649_s9 }
   0xb   : > { %p46_p5 = por %p45_p2, %p44_p1  ;;  %p51_p6 = scmp.eq.s32.totalorder %s485_s17, 0 }
   0xc   : > { %s915_s19 = smov (%p30_p3, %s913_s19), 0  ;;  %p510_p8 = scmp.lt.s32.totalorder %s677_s16, 4 }
   0xd   : > { %p751_p7 = por %p51_p6, %p50_p4  ;;  %s32_s23 = ssub.s32 %s673_s15, %s915_s19 }
   0xe   : > { %s34_s24 = sor.u32 %s33_s21, %s32_s23  ;;  %s126_s25 = sand.u32 1, %s657_s11  }
   0xf   : > { %p35_p9 = scmp.eq.s32.totalorder %s34_s24, 0  ;;  %s498_s26 = smul.u32 80, %s126_s25 }
  0x10   : > { %p759_p10 = pnand %p510_p8, %p46_p5  ;;  %s499_s29 = smul.u32 20, %s673_s15 }
  0x11   : > { %s764_s28 = scalar_select %p35_p9, %s657_s11, %s37_s20  }
  0x12   : > { %s130_s30 = scalar_lea.vmem [#allocation2], %s498_s26  ;;  %s135_s4 = sadd.s32 %s669_s14, %s499_s29 }
  0x13   : > { %s140_s3 = sshll.u32 %s130_s30, 4  ;;  %s491_s5 = sshll.u32 %s135_s4, 3  ;;  %s141_s3 = int_to_ptr.vmem [resolvable:$true] %s140_s3 }
  0x14   : > { %s137_s8 = scalar_lea.hbm %s898_s0, %s491_s5  ;;  %p492_p11 = scmp.ge.s32.totalorder %s677_s16, 1 }
  0x15   : > { %s138_s9 = sshll.u32 %s137_s8, 4  ;;  %s127_s17 = scalar_lea.sflag [#allocation3], %s126_s25  ;;  %s139_s9 = int_to_ptr.hbm [resolvable:$true] %s138_s9 }
  0x16   : > { %s679_s21 = smov 256   ;;  %s680_s23 = smov 128  }
  0x17   : > { %s681_s24 = smov 8   ;;  %p148_p12 = scmp.lt.s32.totalorder %s677_s16, 5 }
  0x18   : > { %509 = dma.hbm_to_vmem [thread:$0]  (!%p759_p10), %s139_s9, 1280, %s141_s3, %s127_s17, %s679_s21, %s680_s23, %s681_s24  }
  0x19   : > { %p149_p13 = pnand %p492_p11, %p148_p12 }
  0x1a   : > { %s154_s20 = sand.u32 (!%p149_p13), 1, %s653_s10  }
  0x1b   : > { %152 = sbr.rel (%p149_p13) target bundleno = 316 (0x13c), region = 24  ;;  %s155_s29 = scalar_lea.sflag (!%p149_p13), [#allocation3], %s154_s20 }
  0x1c   : > { %s500_s26 = smul.u32 (!%p149_p13), 80, %s154_s20 }
  0x1e   : > { %s776_s30 = scalar_lea.vmem (!%p149_p13), [#allocation2], %s500_s26 }
  0x20   : > { %644 = dma.done.wait (%p751_p7), %s155_s29, 1280  }
  0x21   : > { %646 = vsyncadd (%p751_p7), %s155_s29, 4294966016  ;;  %p186_p0 = scmp.lt.s32.totalorder %s665_s13, 1  ;;  %p495_p1 = scmp.ne.s32.totalorder %s661_s12, 0 }
  0x23   : > { %s917_s13 = smov (!%p186_p0, %s665_s13), 1  ;;  %199 = sbr.rel (%p495_p1) target bundleno = 51 (0x33), region = 32 }
  0x24   : > { %s501_s25 = smul.u32 40, %s917_s13 }
  0x26   : > { %s787_s4 = scalar_lea.vmem %s899_s1, %s501_s25  ;;  %s792_s7 = scalar_lea.vmem %s900_s2, %s501_s25 }
  0x28   : > { %vm200_vm0 = vcmask 7168   ;;  %v682_v0 = vmov 0.0  }
  0x29   : > { %201 = vst.msk [vmem:[%s787_s4] sm:$0xff] %vm200_vm0, %v682_v0 }
  0x2a   : > { %202 = vst.msk [vmem:[%s787_s4 + $0x8] sm:$0xff] %vm200_vm0, %v682_v0 }
  0x2b   : > { %203 = vst.msk [vmem:[%s787_s4 + $0x10] sm:$0xff] %vm200_vm0, %v682_v0 }
  0x2c   : > { %204 = vst.msk [vmem:[%s787_s4 + $0x18] sm:$0xff] %vm200_vm0, %v682_v0 }
  0x2d   : > { %205 = vst.msk [vmem:[%s787_s4 + $0x20] sm:$0xff] %vm200_vm0, %v682_v0 }
  0x2e   : > { %206 = vst.msk [vmem:[%s792_s7] sm:$0xff] %vm200_vm0, %v682_v0 }
  0x2f   : > { %207 = vst.msk [vmem:[%s792_s7 + $0x8] sm:$0xff] %vm200_vm0, %v682_v0 }
  0x30   : > { %208 = vst.msk [vmem:[%s792_s7 + $0x10] sm:$0xff] %vm200_vm0, %v682_v0 }
  0x31   : > { %209 = vst.msk [vmem:[%s792_s7 + $0x18] sm:$0xff] %vm200_vm0, %v682_v0 }
  0x32   : > { %210 = vst.msk [vmem:[%s792_s7 + $0x20] sm:$0xff] %vm200_vm0, %v682_v0 }
  0x33 PF: > { %v213_v1 = vld [vmem:[%s776_s30 + $0x10] sm:$0xff]  ;;  %v218_v2 = vld [vmem:[%s776_s30 + $0x38] sm:$0xff]  ;;  %v211_v3 = vld [vmem:[%s776_s30] sm:$0xff]  ;;  %s276_s13 = scvt.s32.f32 %s661_s12  ;;  %vm317_vm5 = vcmask 7168  }
  0x34   : > { %v223_v4 = vadd.f32 %v218_v2, %v213_v1  ;;  %v216_v5 = vld [vmem:[%s776_s30 + $0x28] sm:$0xff]  ;;  %v811_v7 = vld [vmem:[%s776_s30 + $0x20] sm:$0xff]  ;;  %v819_v9 = vld [vmem:[%s776_s30 + $0x18] sm:$0xff] }
  0x35   : > { %v221_v6 = vadd.f32 %v216_v5, %v211_v3  ;;  %s813_s22 = smul.f32 256.0, %s276_s13  ;;  %v816_v8 = vld [vmem:[%s776_s30 + $0x48] sm:$0xff]  ;;  %v822_v10 = vld [vmem:[%s776_s30 + $0x40] sm:$0xff]  ;;  %v831_v13 = vld [vmem:[%s776_s30 + $0x30] sm:$0xff] }
  0x36   : > { %230 = vadd.xlane.f32.xlu1 %v223_v4  ;;  %v225_v11 = vadd.f32 %v816_v8, %v811_v7  ;;  %v828_v12 = vld [vmem:[%s776_s30 + $0x8] sm:$0xff]  ;;  %v224_v15 = vadd.f32 %v822_v10, %v819_v9  ;;  %v281_v27 = vld [vmem:[%s787_s4 + $0x10] sm:$0xff]  ;;  %v279_v30 = vld [vmem:[%s787_s4] sm:$0xff] }
  0x37   : > { %226 = vadd.xlane.f32.xlu0 %v221_v6  ;;  %s278_s12 = sadd.f32 256.0, %s813_s22  ;;  %v222_v16 = vadd.f32 %v831_v13, %v828_v12  ;;  %s338_s8 = smul.f32 256.0, %s813_s22  ;;  %v283_v37 = vld [vmem:[%s787_s4 + $0x20] sm:$0xff]  ;;  %v282_v55 = vld [vmem:[%s787_s4 + $0x18] sm:$0xff]  ;;  %v280_v61 = vld [vmem:[%s787_s4 + $0x8] sm:$0xff] }
  0x38   : > { %234 = vadd.xlane.f32.xlu2 %v225_v11 }
  0x39   : > { %v289_v14 = vstv %s278_s12 }
  0x3a   : > { %579 = vrcp.f32 %v289_v14  ;;  %v301_v19 = vand.u32 2147483648, %v289_v14  ;;  %vm295_vm1 = vweird.f32 %v289_v14  ;;  %v299_v21 = vand.u32 2147483647, %v289_v14 }
  0x3c   : > { %v302_v23 = vor.u32 1.1754944e-38, %v301_v19  ;;  %vm300_vm4 = vcmp.eq.f32.partialorder %v299_v21, 8.507059e+37 }
  0x3e   : > { %232 = vadd.xlane.f32.xlu1 %v224_v15 }
  0x3f   : > { %228 = vadd.xlane.f32.xlu0 %v222_v16 }
  0x40   : > { %v580_v17 = vpop.eup %579 }
  0x41   : > { %v291_v18 = vmul.f32 %v580_v17, %v289_v14  ;;  %vm296_vm2 = vweird.f32 %v580_v17 }
  0x42   : > { %vm297_vm3 = vmor %vm295_vm1, %vm296_vm2 }
  0x43   : > { %v292_v20 = vsub.f32 1.0, %v291_v18 }
  0x45   : > { %v293_v22 = vmul.f32 %v580_v17, %v292_v20 }
  0x47   : > { %v294_v24 = vadd.f32 %v580_v17, %v293_v22 }
  0x49   : > { %v298_v25 = vsel %vm297_vm3, %v580_v17, %v294_v24 }
  0x4a   : > { %v303_v26 = vsel %vm300_vm4, %v302_v23, %v298_v25 }
  0x4b   : > { %502 = vpush %v303_v26 }
  0x7c   : > { %s503_s9 = spop %502 }
  0x7d   : > { %s355_s17 = smul.f32 %s503_s9, %s338_s8 }
  0x7e   : > { %s305_s21 = smul.f32 256.0, %s503_s9 }
  0x7f   : > { %v356_v52 = vstv %s355_s17 }
  0x80   : > { %v306_v34 = vstv %s305_s21 }
  0xa9   : > { %v231_v28 = vpop.xlane.xlu1 %230 }
  0xaa   : > { %v238_v29 = vmul.f32 0.00390625, %v231_v28  ;;  %v227_v31 = vpop.xlane.xlu0 %226 }
  0xab   : > { %v236_v32 = vmul.f32 0.00390625, %v227_v31  ;;  %v235_v38 = vpop.xlane.xlu2 %234  ;;  %v323_v31 = vld [vmem:[%s792_s7] sm:$0xff] }
  0xac   : > { %v286_v33 = vsub.f32 %v238_v29, %v281_v27  ;;  %v243_v35 = vsub.f32 %v213_v1, %v238_v29  ;;  %v248_v36 = vsub.f32 %v218_v2, %v238_v29  ;;  %v240_v42 = vmul.f32 0.00390625, %v235_v38  ;;  %v326_v38 = vld [vmem:[%s792_s7 + $0x18] sm:$0xff] }
  0xad   : > { %v284_v39 = vsub.f32 %v236_v32, %v279_v30  ;;  %v241_v40 = vsub.f32 %v211_v3, %v236_v32  ;;  %v246_v41 = vsub.f32 %v216_v5, %v236_v32 }
  0xae   : > { %v309_v43 = vmul.f32 %v306_v34, %v286_v33  ;;  %v253_v44 = vmul.f32 %v243_v35, %v243_v35  ;;  %v258_v45 = vmul.f32 %v248_v36, %v248_v36  ;;  %v335_v46 = vmul.f32 %v286_v33, %v286_v33 }
  0xaf   : > { %v307_v47 = vmul.f32 %v306_v34, %v284_v39  ;;  %v251_v48 = vmul.f32 %v241_v40, %v241_v40  ;;  %v256_v49 = vmul.f32 %v246_v41, %v246_v41  ;;  %v288_v50 = vsub.f32 %v240_v42, %v283_v37 }
  0xb0   : > { %v314_v51 = vadd.f32 %v309_v43, %v281_v27  ;;  %v263_v53 = vadd.f32 %v258_v45, %v253_v44  ;;  %v359_v59 = vmul.f32 %v356_v52, %v335_v46  ;;  %v333_v63 = vmul.f32 %v284_v39, %v284_v39  ;;  %v324_v39 = vld [vmem:[%s792_s7 + $0x8] sm:$0xff]  ;;  %v327_v46 = vld [vmem:[%s792_s7 + $0x20] sm:$0xff] }
  0xb1   : > { %v312_v54 = vadd.f32 %v307_v47, %v279_v30  ;;  %v233_v56 = vpop.xlane.xlu1 %232  ;;  %v261_v57 = vadd.f32 %v256_v49, %v251_v48  ;;  %v311_v58 = vmul.f32 %v306_v34, %v288_v50  ;;  %v245_v2 = vsub.f32 %v811_v7, %v240_v42  ;;  %v325_v30 = vld [vmem:[%s792_s7 + $0x10] sm:$0xff] }
  0xb2   : > { %320 = vst.msk [vmem:[%s787_s4 + $0x10] sm:$0xff] %vm317_vm5, %v314_v51  ;;  %v239_v60 = vmul.f32 0.00390625, %v233_v56  ;;  %v229_v62 = vpop.xlane.xlu0 %228  ;;  %270 = vadd.xlane.f32.xlu1 %v263_v53  ;;  %v250_v3 = vsub.f32 %v816_v8, %v240_v42  ;;  %v337_v11 = vmul.f32 %v288_v50, %v288_v50  ;;  %v357_v17 = vmul.f32 %v356_v52, %v333_v63 }
  0xb3   : > { %318 = vst.msk [vmem:[%s787_s4] sm:$0xff] %vm317_vm5, %v312_v54  ;;  %v237_v0 = vmul.f32 0.00390625, %v229_v62  ;;  %266 = vadd.xlane.f32.xlu2 %v261_v57  ;;  %v316_v1 = vadd.f32 %v311_v58, %v283_v37  ;;  %v255_v27 = vmul.f32 %v245_v2, %v245_v2 }
  0xb4   : > { %v287_v4 = vsub.f32 %v239_v60, %v282_v55  ;;  %v244_v5 = vsub.f32 %v819_v9, %v239_v60  ;;  %v249_v6 = vsub.f32 %v822_v10, %v239_v60  ;;  %v361_v25 = vmul.f32 %v356_v52, %v337_v11 }
  0xb5   : > { %v285_v14 = vsub.f32 %v237_v0, %v280_v61  ;;  %322 = vst.msk [vmem:[%s787_s4 + $0x20] sm:$0xff] %vm317_vm5, %v316_v1  ;;  %v242_v15 = vsub.f32 %v828_v12, %v237_v0  ;;  %v247_v16 = vsub.f32 %v831_v13, %v237_v0  ;;  %v260_v28 = vmul.f32 %v250_v3, %v250_v3 }
  0xb6   : > { %v310_v18 = vmul.f32 %v306_v34, %v287_v4  ;;  %v254_v7 = vmul.f32 %v244_v5, %v244_v5  ;;  %v259_v19 = vmul.f32 %v249_v6, %v249_v6  ;;  %v336_v8 = vmul.f32 %v287_v4, %v287_v4 }
  0xb7   : > { %v308_v20 = vmul.f32 %v306_v34, %v285_v14  ;;  %v252_v21 = vmul.f32 %v242_v15, %v242_v15  ;;  %v257_v9 = vmul.f32 %v247_v16, %v247_v16  ;;  %v334_v22 = vmul.f32 %v285_v14, %v285_v14 }
  0xb8   : > { %v315_v10 = vadd.f32 %v310_v18, %v282_v55  ;;  %v264_v23 = vadd.f32 %v259_v19, %v254_v7  ;;  %v360_v24 = vmul.f32 %v356_v52, %v336_v8  ;;  %v265_v29 = vadd.f32 %v260_v28, %v255_v27 }
  0xb9   : > { %v313_v12 = vadd.f32 %v308_v20, %v280_v61  ;;  %v262_v26 = vadd.f32 %v257_v9, %v252_v21  ;;  %v358_v13 = vmul.f32 %v356_v52, %v334_v22 }
  0xba   : > { %321 = vst.msk [vmem:[%s787_s4 + $0x18] sm:$0xff] %vm317_vm5, %v315_v10 }
  0xbb   : > { %319 = vst.msk [vmem:[%s787_s4 + $0x8] sm:$0xff] %vm317_vm5, %v313_v12  ;;  %272 = vadd.xlane.f32.xlu2 %v264_v23  ;;  %268 = vadd.xlane.f32.xlu0 %v262_v26 }
  0xc3   : > { %274 = vadd.xlane.f32.xlu0 %v265_v29 }
 0x125   : > { %v271_v32 = vpop.xlane.xlu1 %270 }
 0x126   : > { %v330_v33 = vadd.f32 %v325_v30, %v271_v32  ;;  %v267_v34 = vpop.xlane.xlu2 %266 }
 0x127   : > { %v328_v35 = vadd.f32 %v323_v31, %v267_v34 }
 0x128   : > { %v364_v36 = vadd.f32 %v359_v59, %v330_v33 }
 0x129   : > { %v362_v37 = vadd.f32 %v357_v17, %v328_v35 }
 0x12a   : > { %369 = vst.msk [vmem:[%s792_s7 + $0x10] sm:$0xff] %vm317_vm5, %v364_v36 }
 0x12b   : > { %367 = vst.msk [vmem:[%s792_s7] sm:$0xff] %vm317_vm5, %v362_v37 }
 0x12e   : > { %v273_v40 = vpop.xlane.xlu2 %272  ;;  %v269_v41 = vpop.xlane.xlu0 %268 }
 0x12f   : > { %v331_v42 = vadd.f32 %v326_v38, %v273_v40  ;;  %v329_v43 = vadd.f32 %v324_v39, %v269_v41 }
 0x131   : > { %v365_v44 = vadd.f32 %v360_v24, %v331_v42  ;;  %v363_v45 = vadd.f32 %v358_v13, %v329_v43 }
 0x133   : > { %370 = vst.msk [vmem:[%s792_s7 + $0x18] sm:$0xff] %vm317_vm5, %v365_v44 }
 0x134   : > { %368 = vst.msk [vmem:[%s792_s7 + $0x8] sm:$0xff] %vm317_vm5, %v363_v45 }
 0x136   : > { %v275_v47 = vpop.xlane.xlu0 %274 }
 0x137   : > { %v332_v48 = vadd.f32 %v327_v46, %v275_v47 }
 0x139   : > { %v366_v49 = vadd.f32 %v361_v25, %v332_v48 }
 0x13b   : > { %371 = vst.msk [vmem:[%s792_s7 + $0x20] sm:$0xff] %vm317_vm5, %v366_v49 }
 0x13c PF: > { %s16_s16 = sadd.s32 1, %s677_s16   ;;  %s903_s9 = smov %s653_s10 }
 0x13d   : > { %p13_p2 = scmp.ge.s32.totalorder %s16_s16, 6   ;;  %s904_s10 = smov %s657_s11 }
 0x13e   : > { %s905_s11 = smov %s764_s28  ;;  %s906_s12 = smov %s669_s14 }
 0x13f   : > { %s907_s13 = smov %s673_s15  ;;  %s908_s14 = smov %s911_s18 }
 0x140   : > { %s909_s15 = smov %s915_s19  ;;  %15 = sbr.rel (!%p13_p2) target bundleno = 5 (0x5), region = 80 }
 0x145   :  { %409 = vsyncpa [#allocation3], 1 }
 0x146   :  { %411 = vsyncpa [#allocation3 + $0x1], 1 }

</bundles_post_ra>
